<compile_context>
chip_gen: v7x
topology: tpu7x:2x2x1
jax: 0.10.0
libtpu: 0.0.40
codegen_flags: <defaults>
</compile_context>

<pallas_src>
import jax
import jax.numpy as jnp
from jax import lax
from jax.experimental import pallas as pl
from jax.experimental.pallas import tpu as pltpu


def attention_kernel(enc_ref, tgt_ref, w_ref, b_ref, out_ref):
    # enc_ref: (S, B, H), tgt_ref: (T, B, H), w_ref: (H, H), b_ref: (1, H),
    # out_ref: (T, B, H).  All whole-array resident in VMEM (single invocation).
    num_batch = enc_ref.shape[1]
    w = w_ref[...]                      # (H, H)  PyTorch nn.Linear weight (out, in)
    bias = b_ref[...]                   # (1, H)

    # Statically unrolled over the (small) batch axis; no in-kernel transposes
    # or reshapes anywhere below.
    for b in range(num_batch):
        enc_b = enc_ref[:, b, :]        # (S, H)  static slice of the batch axis
        tgt_b = tgt_ref[:, b, :]        # (T, H)

        # q = tgt @ W : rearranged projection (contracts H with W's output dim),
        # replaces the original dense_enc = enc @ W^T (S*H*H -> T*H*H FLOPs).
        q = jnp.dot(tgt_b, w, preferred_element_type=jnp.float32)          # (T, H)

        # Linear bias contribution: constant along the softmax (S) axis; kept so the
        # score matches tgt @ dense(enc)^T exactly (softmax cancels it anyway).
        score_bias = jnp.sum(tgt_b * bias, axis=-1, keepdims=True)         # (T, 1)

        # score = q @ enc^T without materializing a transpose: contract last dims.
        score = lax.dot_general(
            q, enc_b,
            dimension_numbers=(((1,), (1,)), ((), ())),
            preferred_element_type=jnp.float32,
        ) + score_bias                                                      # (T, S)

        # softmax over S (dim=2 of the logical (B,T,S) score)
        score = score - jnp.max(score, axis=-1, keepdims=True)
        p = jnp.exp(score)
        # NOTE: approx=True would push this onto the otherwise-idle EUP slot (perf
        # feedback); kept exact here since the (T,1) normalization is off the
        # critical path at these shapes and exactness preserves 1e-5 reference parity.
        attn = p * pl.reciprocal(jnp.sum(p, axis=-1, keepdims=True), approx=False)

        # context = attn @ enc  (attn kept in f32 for the second matmul)
        ctx = jnp.dot(attn, enc_b, preferred_element_type=jnp.float32)     # (T, H)

        out_ref[:, b, :] = ctx.astype(out_ref.dtype)


def attention_forward(encoder_output, target_output, w, b):
    """encoder_output: (S, B, H), target_output: (T, B, H) -> context: (T, B, H).

    No layout transposes anywhere: the kernel reads/writes the seq-first tensors
    in place.  Single gridless invocation; all operands whole-array in VMEM.
    For large B/S one would re-grid over batch blocks ("parallel" semantics for
    v7x's 2 TensorCores) and tile S with an online softmax under v7x's 64 MiB VMEM.
    """
    S, B, H = encoder_output.shape
    T = target_output.shape[0]
    b2 = b.reshape(1, H)

    vmem = pl.BlockSpec(memory_space=pltpu.MemorySpace.VMEM)
    return pl.pallas_call(
        attention_kernel,
        out_shape=jax.ShapeDtypeStruct((T, B, H), encoder_output.dtype),
        in_specs=[vmem, vmem, vmem, vmem],
        out_specs=vmem,
    )(encoder_output, target_output, w, b2)


def reference_forward(encoder_output, target_output, w, b):
    """Pure-JAX reference mirroring the PyTorch code exactly."""
    enc = jnp.transpose(encoder_output, (1, 0, 2))    # (B, S, H)
    tgt = jnp.transpose(target_output, (1, 0, 2))     # (B, T, H)
    dense_enc = enc @ w.T + b                         # (B, S, H)
    score = jnp.einsum('bth,bsh->bts', tgt, dense_enc)
    attn = jax.nn.softmax(score, axis=2)
    ctx = jnp.einsum('bts,bsh->bth', attn, enc)
    return jnp.transpose(ctx, (1, 0, 2))              # (T, B, H)


if __name__ == "__main__":
    # Small deterministic shapes: seq S=8, target T=8, batch B=2, hidden H=32
    S, T, B, H = 8, 8, 2, 32
    key = jax.random.PRNGKey(0)
    k1, k2, k3, k4 = jax.random.split(key, 4)

    encoder_output = jax.random.normal(k1, (S, B, H), dtype=jnp.float32)
    target_output = jax.random.normal(k2, (T, B, H), dtype=jnp.float32)

    # nn.Linear(H, H) parameters: weight (H, H), bias (H,)
    bound = 1.0 / (H ** 0.5)
    w = jax.random.uniform(k3, (H, H), minval=-bound, maxval=bound, dtype=jnp.float32)
    b = jax.random.uniform(k4, (H,), minval=-bound, maxval=bound, dtype=jnp.float32)

    out = attention_forward(encoder_output, target_output, w, b)
    out = jax.block_until_ready(out)

    ref = reference_forward(encoder_output, target_output, w, b)
    assert out.shape == (T, B, H), out.shape
    assert jnp.allclose(out, ref, atol=1e-5, rtol=1e-5), "mismatch vs reference"

    print("KERNEL_OK")
</pallas_src>

<mosaic_0001>
module attributes {stable_mosaic.version = 11 : i64} {
  func.func @attention_kernel(%arg0: memref<8x2x32xf32, #tpu.memory_space<vmem>>, %arg1: memref<8x2x32xf32, #tpu.memory_space<vmem>>, %arg2: memref<32x32xf32, #tpu.memory_space<vmem>>, %arg3: memref<1x32xf32, #tpu.memory_space<vmem>>, %arg4: memref<8x2x32xf32, #tpu.memory_space<vmem>>) attributes {dimension_semantics = [], scalar_prefetch = 0 : i64, scratch_operands = 0 : i64, tpu.core_type = #tpu.core_type<tc>} {
    %c0 = arith.constant 0 : index
    %c0_0 = arith.constant 0 : index
    %0 = vector.load %arg2[%c0, %c0_0] : memref<32x32xf32, #tpu.memory_space<vmem>>, vector<32x32xf32>
    %c0_1 = arith.constant 0 : index
    %c0_2 = arith.constant 0 : index
    %1 = vector.load %arg3[%c0_1, %c0_2] : memref<1x32xf32, #tpu.memory_space<vmem>>, vector<1x32xf32>
    %c0_3 = arith.constant 0 : index
    %c0_4 = arith.constant 0 : index
    %c0_5 = arith.constant 0 : index
    %2 = vector.load %arg0[%c0_3, %c0_4, %c0_5] : memref<8x2x32xf32, #tpu.memory_space<vmem>>, vector<8x1x32xf32>
    %3 = vector.shape_cast %2 : vector<8x1x32xf32> to vector<8x32xf32>
    %c0_6 = arith.constant 0 : index
    %c0_7 = arith.constant 0 : index
    %c0_8 = arith.constant 0 : index
    %4 = vector.load %arg1[%c0_6, %c0_7, %c0_8] : memref<8x2x32xf32, #tpu.memory_space<vmem>>, vector<8x1x32xf32>
    %5 = vector.shape_cast %4 : vector<8x1x32xf32> to vector<8x32xf32>
    %cst = arith.constant dense<0.000000e+00> : vector<8x32xf32>
    %6 = tpu.matmul %5, %0, %cst {dimension_numbers = #tpu.dot_dimension_numbers<[1], [0], [0], [1], [0, 0, 1, 1], [], []>} : vector<8x32xf32>, vector<32x32xf32>, vector<8x32xf32> -> vector<8x32xf32>
    %7 = vector.broadcast %1 : vector<1x32xf32> to vector<8x32xf32>
    %8 = arith.mulf %5, %7 : vector<8x32xf32>
    %cst_9 = arith.constant dense<0.000000e+00> : vector<8xf32>
    %9 = vector.multi_reduction <add>, %8, %cst_9 [1] : vector<8x32xf32> to vector<8xf32>
    %10 = vector.shape_cast %9 : vector<8xf32> to vector<8x1xf32>
    %cst_10 = arith.constant dense<0.000000e+00> : vector<8x8xf32>
    %11 = tpu.matmul %6, %3, %cst_10 {dimension_numbers = #tpu.dot_dimension_numbers<[1], [1], [0], [0], [0, 0, 1, 0], [], []>} : vector<8x32xf32>, vector<8x32xf32>, vector<8x8xf32> -> vector<8x8xf32>
    %12 = vector.broadcast %10 : vector<8x1xf32> to vector<8x8xf32>
    %13 = arith.addf %11, %12 : vector<8x8xf32>
    %cst_11 = arith.constant dense<0xFF800000> : vector<8xf32>
    %14 = vector.multi_reduction <maximumf>, %13, %cst_11 [1] : vector<8x8xf32> to vector<8xf32>
    %15 = vector.shape_cast %14 : vector<8xf32> to vector<8x1xf32>
    %16 = vector.broadcast %15 : vector<8x1xf32> to vector<8x8xf32>
    %17 = arith.subf %13, %16 : vector<8x8xf32>
    %18 = math.exp %17 : vector<8x8xf32>
    %cst_12 = arith.constant dense<0.000000e+00> : vector<8xf32>
    %19 = vector.multi_reduction <add>, %18, %cst_12 [1] : vector<8x8xf32> to vector<8xf32>
    %20 = vector.shape_cast %19 : vector<8xf32> to vector<8x1xf32>
    %21 = tpu.reciprocal %20 : vector<8x1xf32> -> vector<8x1xf32>
    %22 = vector.broadcast %21 : vector<8x1xf32> to vector<8x8xf32>
    %23 = arith.mulf %18, %22 : vector<8x8xf32>
    %cst_13 = arith.constant dense<0.000000e+00> : vector<8x32xf32>
    %24 = tpu.matmul %23, %3, %cst_13 {dimension_numbers = #tpu.dot_dimension_numbers<[1], [0], [0], [1], [0, 0, 1, 1], [], []>} : vector<8x8xf32>, vector<8x32xf32>, vector<8x32xf32> -> vector<8x32xf32>
    %c0_14 = arith.constant 0 : index
    %c0_15 = arith.constant 0 : index
    %c0_16 = arith.constant 0 : index
    %25 = vector.load %arg4[%c0_14, %c0_15, %c0_16] : memref<8x2x32xf32, #tpu.memory_space<vmem>>, vector<8x1x32xf32>
    %26 = vector.shape_cast %25 : vector<8x1x32xf32> to vector<8x32xf32>
    %27 = vector.shape_cast %24 : vector<8x32xf32> to vector<8x1x32xf32>
    tpu.vector_store %arg4[%c0_14, %c0_15, %c0_16], %27 {strides = array<i32>} : memref<8x2x32xf32, #tpu.memory_space<vmem>>, vector<8x1x32xf32>,
    %c0_17 = arith.constant 0 : index
    %c1 = arith.constant 1 : index
    %c0_18 = arith.constant 0 : index
    %28 = vector.load %arg0[%c0_17, %c1, %c0_18] : memref<8x2x32xf32, #tpu.memory_space<vmem>>, vector<8x1x32xf32>
    %29 = vector.shape_cast %28 : vector<8x1x32xf32> to vector<8x32xf32>
    %c0_19 = arith.constant 0 : index
    %c1_20 = arith.constant 1 : index
    %c0_21 = arith.constant 0 : index
    %30 = vector.load %arg1[%c0_19, %c1_20, %c0_21] : memref<8x2x32xf32, #tpu.memory_space<vmem>>, vector<8x1x32xf32>
    %31 = vector.shape_cast %30 : vector<8x1x32xf32> to vector<8x32xf32>
    %cst_22 = arith.constant dense<0.000000e+00> : vector<8x32xf32>
    %32 = tpu.matmul %31, %0, %cst_22 {dimension_numbers = #tpu.dot_dimension_numbers<[1], [0], [0], [1], [0, 0, 1, 1], [], []>} : vector<8x32xf32>, vector<32x32xf32>, vector<8x32xf32> -> vector<8x32xf32>
    %33 = vector.broadcast %1 : vector<1x32xf32> to vector<8x32xf32>
    %34 = arith.mulf %31, %33 : vector<8x32xf32>
    %cst_23 = arith.constant dense<0.000000e+00> : vector<8xf32>
    %35 = vector.multi_reduction <add>, %34, %cst_23 [1] : vector<8x32xf32> to vector<8xf32>
    %36 = vector.shape_cast %35 : vector<8xf32> to vector<8x1xf32>
    %cst_24 = arith.constant dense<0.000000e+00> : vector<8x8xf32>
    %37 = tpu.matmul %32, %29, %cst_24 {dimension_numbers = #tpu.dot_dimension_numbers<[1], [1], [0], [0], [0, 0, 1, 0], [], []>} : vector<8x32xf32>, vector<8x32xf32>, vector<8x8xf32> -> vector<8x8xf32>
    %38 = vector.broadcast %36 : vector<8x1xf32> to vector<8x8xf32>
    %39 = arith.addf %37, %38 : vector<8x8xf32>
    %cst_25 = arith.constant dense<0xFF800000> : vector<8xf32>
    %40 = vector.multi_reduction <maximumf>, %39, %cst_25 [1] : vector<8x8xf32> to vector<8xf32>
    %41 = vector.shape_cast %40 : vector<8xf32> to vector<8x1xf32>
    %42 = vector.broadcast %41 : vector<8x1xf32> to vector<8x8xf32>
    %43 = arith.subf %39, %42 : vector<8x8xf32>
    %44 = math.exp %43 : vector<8x8xf32>
    %cst_26 = arith.constant dense<0.000000e+00> : vector<8xf32>
    %45 = vector.multi_reduction <add>, %44, %cst_26 [1] : vector<8x8xf32> to vector<8xf32>
    %46 = vector.shape_cast %45 : vector<8xf32> to vector<8x1xf32>
    %47 = tpu.reciprocal %46 : vector<8x1xf32> -> vector<8x1xf32>
    %48 = vector.broadcast %47 : vector<8x1xf32> to vector<8x8xf32>
    %49 = arith.mulf %44, %48 : vector<8x8xf32>
    %cst_27 = arith.constant dense<0.000000e+00> : vector<8x32xf32>
    %50 = tpu.matmul %49, %29, %cst_27 {dimension_numbers = #tpu.dot_dimension_numbers<[1], [0], [0], [1], [0, 0, 1, 1], [], []>} : vector<8x8xf32>, vector<8x32xf32>, vector<8x32xf32> -> vector<8x32xf32>
    %c0_28 = arith.constant 0 : index
    %c1_29 = arith.constant 1 : index
    %c0_30 = arith.constant 0 : index
    %51 = vector.load %arg4[%c0_28, %c1_29, %c0_30] : memref<8x2x32xf32, #tpu.memory_space<vmem>>, vector<8x1x32xf32>
    %52 = vector.shape_cast %51 : vector<8x1x32xf32> to vector<8x32xf32>
    %53 = vector.shape_cast %50 : vector<8x32xf32> to vector<8x1x32xf32>
    tpu.vector_store %arg4[%c0_28, %c1_29, %c0_30], %53 {strides = array<i32>} : memref<8x2x32xf32, #tpu.memory_space<vmem>>, vector<8x1x32xf32>,
    return
  }
}

</mosaic_0001>

<bundles_post_ra>
// kernel: tpu_custom_call.1
= control target key start
LH: loop header
LB: loop body
LE: loop exit
PB: predicated region body
PF: predicated region fallthrough
CT: control target
= control target key end

     0   :  { %9 = vsyncpa [#allocation3], 0  ;;  %s1307_s0 = inlined_call_operand.hbm [shape: f32[8,2,32], index: 0, kind: input, shape index: {}]   ;;  %s1308_s1 = inlined_call_operand.hbm [shape: f32[8,2,32], index: 1, kind: input, shape index: {}]   ;;  %s1309_s2 = inlined_call_operand.hbm [shape: f32[32,32], index: 2, kind: input, shape index: {}]   ;;  %s1310_s3 = inlined_call_operand.vmem [shape: f32[1,32], index: 3, kind: input, shape index: {}]   ;;  %s1311_s4 = inlined_call_operand.hbm [shape: f32[8,2,32], index: 4, kind: output, shape index: {}]  }
   0x1   :  { %10 = vsyncpa [#allocation6], 0 }
   0x2   :  { %11 = vsyncpa [#allocation4], 0  ;;  %s1077_s15 = smov [#allocation5]   ;;  %s1078_s17 = smov [#allocation2]  }
   0x3   :  { %s29_s16 = sshll.u32 %s1077_s15, 4  ;;  %s17_s18 = sshll.u32 %s1078_s17, 4  ;;  %s30_s16 = int_to_ptr.vmem [resolvable:$true] %s29_s16  ;;  %s1114_s18 = int_to_ptr.vmem [resolvable:$true] %s17_s18 }
   0x4   :  { %s983_s21 = scalar_lea.hbm %s1308_s1, 256 }
   0x5   :  { %p984_p0 = scmp.ne.s32.totalorder %s1308_s1, %s983_s21  ;;  %p987_p1 = scmp.lt.u32.totalorder %s983_s21, %s1308_s1 }
   0x7   :  { %p989_p2 = pnand %p987_p1, %p984_p0 }
   0x9   :  { %992 = shalt.err (!%p989_p2)
}
   0xa   :  { %s993_s26 = scalar_lea.vmem %s30_s16, 256  ;;  %p998_p4 = scmp.lt.s32.totalorder %s30_s16, %s30_s16 }
   0xb   :  { %p994_p3 = scmp.ne.s32.totalorder %s30_s16, %s993_s26  ;;  %p999_p5 = scmp.lt.s32.totalorder %s993_s26, %s993_s26 }
   0xd   :  { %p1000_p6 = por %p999_p5, %p998_p4 }
   0xf   :  { %p1001_p7 = pnand %p1000_p6, %p994_p3 }
  0x11   :  { %1004 = shalt.err (!%p1001_p7)
}
  0x12   :  { %s1079_s27 = smov 32   ;;  %s1080_s28 = smov 2  }
  0x13   :  { %35 = dma.hbm_to_vmem [thread:$0]  %s1308_s1, 256, %s30_s16, [#allocation6], %s1079_s27, %s1079_s27, %s1080_s28  }
  0x14   :  { %s1005_s7 = scalar_lea.hbm %s1307_s0, 256 }
  0x15   :  { %p1006_p8 = scmp.ne.s32.totalorder %s1307_s0, %s1005_s7  ;;  %p1009_p9 = scmp.lt.u32.totalorder %s1005_s7, %s1307_s0 }
  0x17   :  { %p1011_p10 = pnand %p1009_p9, %p1006_p8 }
  0x19   :  { %1014 = shalt.err (!%p1011_p10)
}
  0x1a   :  { %s1015_s12 = scalar_lea.vmem %s1114_s18, 256  ;;  %p1020_p12 = scmp.lt.s32.totalorder %s1114_s18, %s1114_s18 }
  0x1b   :  { %p1016_p11 = scmp.ne.s32.totalorder %s1114_s18, %s1015_s12  ;;  %p1021_p13 = scmp.lt.s32.totalorder %s1015_s12, %s1015_s12 }
  0x1d   :  { %p1022_p0 = por %p1021_p13, %p1020_p12 }
  0x1f   :  { %p1023_p1 = pnand %p1022_p0, %p1016_p11 }
  0x21   :  { %1026 = shalt.err (!%p1023_p1)
}
  0x22   :  { %23 = dma.hbm_to_vmem [thread:$0]  %s1307_s0, 256, %s1114_s18, [#allocation3], %s1079_s27, %s1079_s27, %s1080_s28  }
  0x23   :  { %s1081_s14 = smov [#allocation7]   ;;  %s1027_s19 = scalar_lea.hbm %s1309_s2, 512 }
  0x24   :  { %s41_s15 = sshll.u32 %s1081_s14, 4  ;;  %p1028_p2 = scmp.ne.s32.totalorder %s1309_s2, %s1027_s19  ;;  %s42_s15 = int_to_ptr.vmem [resolvable:$true] %s41_s15 }
  0x25   :  { %p1031_p3 = scmp.lt.u32.totalorder %s1027_s19, %s1309_s2 }
  0x27   :  { %p1033_p4 = pnand %p1031_p3, %p1028_p2 }
  0x29   :  { %1036 = shalt.err (!%p1033_p4)
}
  0x2a   :  { %s1037_s24 = scalar_lea.vmem %s42_s15, 512  ;;  %p1042_p6 = scmp.lt.s32.totalorder %s42_s15, %s42_s15 }
  0x2b   :  { %p1038_p5 = scmp.ne.s32.totalorder %s42_s15, %s1037_s24  ;;  %p1043_p7 = scmp.lt.s32.totalorder %s1037_s24, %s1037_s24 }
  0x2d   :  { %p1044_p8 = por %p1043_p7, %p1042_p6 }
  0x2f   :  { %p1045_p9 = pnand %p1044_p8, %p1038_p5 }
  0x31   :  { %1048 = shalt.err (!%p1045_p9)
}
  0x32   :  { %s1082_s0 = smov 128   ;;  %s1083_s18 = smov 8  }
  0x33   :  { %47 = dma.hbm_to_vmem [thread:$0]  %s1309_s2, 512, %s42_s15, [#allocation6], %s1082_s0, %s1082_s0, %s1083_s18  }
  0x34   :  { %1071 = dma.done.wait [#allocation3], 256  }
  0x35   :  { %1072 = vsyncadd [#allocation3], 4294967040 }
  0x36   :  { %1073 = dma.done.wait [#allocation6], 768  }
  0x37   :  { %1074 = vsyncadd [#allocation6], 4294966528  ;;  %v1084_v0 = vmov 0.0|0.0   ;;  %vm1085_vm0 = vmmov 0   ;;  %v1086_v1 = vmov 0.0   ;;  %v59_v2 = vld [vmem:[#allocation7] sm:$0xff] }
  0x38   :  { %951 = vmatprep.subr.bf16.mxu0 %v1084_v0  ;;  %917 = vmatprep.mubr.msk.f32.mxu0 %vm1085_vm0, %v1086_v1  ;;  %v60_v3 = vld [vmem:[#allocation7 + $0x8] sm:$0xff]  ;;  %v61_v4 = vld [vmem:[#allocation7 + $0x10] sm:$0xff]  ;;  %v62_v6 = vld [vmem:[#allocation7 + $0x18] sm:$0xff]  ;;  %vm89_vm1 = vcmask 1041409   ;;  %vm92_vm2 = vcmask 1042434   ;;  %vm95_vm3 = vcmask 1043459  }
  0x39   :  { %920 = vmatprep.subr.mxu1 %v1086_v1  ;;  %922 = vmatprep.mubr.msk.f32.mxu1 %vm1085_vm0, %v1086_v1  ;;  %v952_v5 = vpack.c.bf16 %v60_v3, %v59_v2  ;;  %v1169_v7 = vld [vmem:[#allocation5 + $0x2] sm:$0x1]  ;;  %v1171_v8 = vld [vmem:[#allocation5 + $0x4] sm:$0x1]  ;;  %v1173_v9 = vld [vmem:[#allocation5 + $0x6] sm:$0x1]  ;;  %v955_v11 = vpack.c.bf16 %v62_v6, %v61_v4 }
  0x3a   :  { %v1175_v10 = vld [vmem:[#allocation5 + $0x8] sm:$0x1]  ;;  %v72_v12 = vld [vmem:[#allocation5] sm:$0x1]  ;;  %v77_v13 = vld [vmem:[#allocation5 + $0xa] sm:$0x1] }
  0x3b   :  { %953 = vmatpush3.bf16.msra.mxu0 %v952_v5  ;;  %v78_v14 = vld [vmem:[#allocation5 + $0xc] sm:$0x1]  ;;  %v79_v15 = vld [vmem:[#allocation5 + $0xe] sm:$0x1]  ;;  %v88_v16 = vrot.slane %v1169_v7, 7  ;;  %v91_v17 = vrot.slane %v1171_v8, 6 }
  0x3c   :  { %954 = vmatprep.subr.bf16.mxu0 %v1084_v0  ;;  %v94_v18 = vrot.slane %v1173_v9, 5  ;;  %vm98_vm4 = vcmask 1044484   ;;  %v97_v19 = vrot.slane %v1175_v10, 4  ;;  %v100_v20 = vrot.slane %v77_v13, 3  ;;  %v65_v21 = vld [vmem:[#allocation2 + $0x2] sm:$0x1] }
  0x3d   :  { %vm101_vm5 = vcmask 1045509   ;;  %vm104_vm6 = vcmask 1046534   ;;  %v90_v22 = vsel %vm89_vm1, %v88_v16, %v72_v12  ;;  %v66_v23 = vld [vmem:[#allocation2 + $0x4] sm:$0x1]  ;;  %v67_v24 = vld [vmem:[#allocation2 + $0x6] sm:$0x1] }
  0x3e   :  { %v68_v25 = vld [vmem:[#allocation2 + $0x8] sm:$0x1]  ;;  %v93_v26 = vsel %vm92_vm2, %v91_v17, %v90_v22  ;;  %v103_v27 = vrot.slane %v78_v14, 2  ;;  %v106_v28 = vrot.slane %v79_v15, 1  ;;  %v64_v29 = vld [vmem:[#allocation2] sm:$0x1] }
  0x3f   :  { %956 = vmatpush3.bf16.msra.mxu0 %v955_v11  ;;  %v69_v30 = vld [vmem:[#allocation2 + $0xa] sm:$0x1]  ;;  %v96_v31 = vsel %vm95_vm3, %v94_v18, %v93_v26  ;;  %v70_v32 = vld [vmem:[#allocation2 + $0xc] sm:$0x1]  ;;  %v230_v33 = vrot.slane %v65_v21, 7  ;;  %v232_v34 = vrot.slane %v66_v23, 6 }
  0x40   :  { %v234_v35 = vrot.slane %v67_v24, 5  ;;  %957 = vmatprep.subr.bf16.mxu0 %v1084_v0  ;;  %v99_v36 = vsel %vm98_vm4, %v97_v19, %v96_v31  ;;  %vm107_vm7 = vcmask 1047559   ;;  %v71_v37 = vld [vmem:[#allocation2 + $0xe] sm:$0x1]  ;;  %v236_v38 = vrot.slane %v68_v25, 4 }
  0x41   :  { %v102_v39 = vsel %vm101_vm5, %v100_v20, %v99_v36  ;;  %vm109_vm8 = vcmask 261120   ;;  %v231_v40 = vsel %vm89_vm1, %v230_v33, %v64_v29  ;;  %v238_v41 = vrot.slane %v69_v30, 3  ;;  %v1206_v52 = vld [vmem:[%s1310_s3] ss:$0 sm:$0xff]  ;;  %v481_v16 = vld [vmem:[#allocation5 + $0x3] sm:$0x1] }
  0x42   :  { %v105_v42 = vsel %vm104_vm6, %v103_v27, %v102_v39  ;;  %v233_v43 = vsel %vm92_vm2, %v232_v34, %v231_v40  ;;  %v240_v44 = vrot.slane %v70_v32, 2  ;;  %v242_v47 = vrot.slane %v71_v37, 1  ;;  %v482_v17 = vld [vmem:[#allocation5 + $0x5] sm:$0x1]  ;;  %v483_v18 = vld [vmem:[#allocation5 + $0x7] sm:$0x1] }
  0x43   :  { %v108_v45 = vsel %vm107_vm7, %v106_v28, %v105_v42  ;;  %v235_v46 = vsel %vm95_vm3, %v234_v35, %v233_v43  ;;  %v188_v53 = vmul.f32 %v1206_v52, %v72_v12  ;;  %v189_v54 = vmul.f32 %v1206_v52, %v1169_v7  ;;  %v484_v19 = vld [vmem:[#allocation5 + $0x9] sm:$0x1]  ;;  %v485_v20 = vld [vmem:[#allocation5 + $0xb] sm:$0x1]  ;;  %v486_v21 = vld [vmem:[#allocation5 + $0xd] sm:$0x1] }
  0x44   :  { %918 = vmatmul.mubr.msk.f32.vlgmr.msra.gmra.mrb[0].mxu0 %vm109_vm8, %v108_v45  ;;  %v237_v48 = vsel %vm98_vm4, %v236_v38, %v235_v46  ;;  %v190_v55 = vmul.f32 %v1206_v52, %v1171_v8  ;;  %v191_v56 = vmul.f32 %v1206_v52, %v1173_v9  ;;  %v192_v57 = vmul.f32 %v1206_v52, %v1175_v10  ;;  %v487_v24 = vld [vmem:[#allocation5 + $0xf] sm:$0x1]  ;;  %s1088_s3 = smov [#allocation8]  }
  0x45   :  { %v239_v49 = vsel %vm101_vm5, %v238_v41, %v237_v48  ;;  %959 = vmatpush3.bf16.msra.mxu0 %v952_v5  ;;  %938 = vmatprep.mubr.msk.f32.mxu0 %vm1085_vm0, %v1086_v1  ;;  %v193_v58 = vmul.f32 %v1206_v52, %v77_v13  ;;  %v194_v59 = vmul.f32 %v1206_v52, %v78_v14  ;;  %v204_v61 = vrot.slane %v189_v54, 7  ;;  %s869_s30 = sshll.u32 %s1088_s3, 4  ;;  %s870_s30 = int_to_ptr.vmem [resolvable:$true] %s869_s30 }
  0x46   :  { %v241_v50 = vsel %vm104_vm6, %v240_v44, %v239_v49  ;;  %960 = vmatprep.subr.bf16.mxu0 %v1084_v0  ;;  %v195_v60 = vmul.f32 %v1206_v52, %v79_v15  ;;  %v206_v62 = vrot.slane %v190_v55, 6  ;;  %v208_v63 = vrot.slane %v191_v56, 5  ;;  %v480_v15 = vld [vmem:[#allocation5 + $0x1] sm:$0x1]  ;;  %s1049_s5 = scalar_lea.vmem %s870_s30, 256  ;;  %p1054_p11 = scmp.lt.s32.totalorder %s870_s30, %s870_s30 }
  0x47   :  { %v243_v51 = vsel %vm107_vm7, %v242_v47, %v241_v50  ;;  %v210_v0 = vrot.slane %v192_v57, 4  ;;  %v205_v2 = vsel %vm89_vm1, %v204_v61, %v188_v53  ;;  %v212_v3 = vrot.slane %v193_v58, 3  ;;  %p1050_p10 = scmp.ne.s32.totalorder %s870_s30, %s1049_s5  ;;  %p1055_p12 = scmp.lt.s32.totalorder %s1049_s5, %s1049_s5 }
  0x48   :  { %921 = vmatpush3.xpose.msk.msra.mxu1 %vm109_vm8, %v243_v51  ;;  %v207_v4 = vsel %vm92_vm2, %v206_v62, %v205_v2  ;;  %v214_v5 = vrot.slane %v194_v59, 2  ;;  %v216_v7 = vrot.slane %v195_v60, 1  ;;  %v496_v22 = vrot.slane %v481_v16, 7 }
  0x49   :  { %962 = vmatpush3.bf16.msra.mxu0 %v955_v11  ;;  %925 = vmatprep.subr.mxu1 %v1086_v1  ;;  %v209_v6 = vsel %vm95_vm3, %v208_v63, %v207_v4  ;;  %v498_v23 = vrot.slane %v482_v17, 6  ;;  %v500_v25 = vrot.slane %v483_v18, 5  ;;  %v502_v26 = vrot.slane %v484_v19, 4  ;;  %p1056_p13 = por %p1055_p12, %p1054_p11 }
  0x4a   :  { %v211_v8 = vsel %vm98_vm4, %v210_v0, %v209_v6  ;;  %v497_v27 = vsel %vm89_vm1, %v496_v22, %v480_v15  ;;  %v504_v28 = vrot.slane %v485_v20, 3  ;;  %v506_v30 = vrot.slane %v486_v21, 2 }
  0x4b   :  { %v213_v9 = vsel %vm101_vm5, %v212_v3, %v211_v8  ;;  %v499_v29 = vsel %vm92_vm2, %v498_v23, %v497_v27  ;;  %v508_v32 = vrot.slane %v487_v24, 1  ;;  %vm319_vm9 = vcmask 64512   ;;  %v478_v23 = vld [vmem:[#allocation2 + $0xd] sm:$0x1]  ;;  %p1057_p0 = pnand %p1056_p13, %p1050_p10 }
  0x4c   :  { %v215_v10 = vsel %vm104_vm6, %v214_v5, %v213_v9  ;;  %v501_v31 = vsel %vm95_vm3, %v500_v25, %v499_v29  ;;  %v582_v49 = vmul.f32 %v1206_v52, %v480_v15  ;;  %v583_v50 = vmul.f32 %v1206_v52, %v481_v16  ;;  %v473_v9 = vld [vmem:[#allocation2 + $0x3] sm:$0x1]  ;;  %v476_v16 = vld [vmem:[#allocation2 + $0x9] sm:$0x1] }
  0x4d   :  { %v217_v11 = vsel %vm107_vm7, %v216_v7, %v215_v10  ;;  %v503_v33 = vsel %vm98_vm4, %v502_v26, %v501_v31  ;;  %v585_v53 = vmul.f32 %v1206_v52, %v483_v18  ;;  %v586_v54 = vmul.f32 %v1206_v52, %v484_v19  ;;  %v474_v10 = vld [vmem:[#allocation2 + $0x5] sm:$0x1]  ;;  %v477_v19 = vld [vmem:[#allocation2 + $0xb] sm:$0x1]  ;;  %v479_v26 = vld [vmem:[#allocation2 + $0xf] sm:$0x1] }
  0x4e   :  { %v219_v12 = vsel %vm109_vm8, %v217_v11, 0.0  ;;  %v505_v34 = vsel %vm101_vm5, %v504_v28, %v503_v33  ;;  %v587_v55 = vmul.f32 %v1206_v52, %v485_v20  ;;  %v588_v56 = vmul.f32 %v1206_v52, %v486_v21 }
  0x4f   :  { %220 = vadd.xlane.f32.xlu0 %v219_v12  ;;  %v507_v35 = vsel %vm104_vm6, %v506_v30, %v505_v34  ;;  %v589_v57 = vmul.f32 %v1206_v52, %v487_v24  ;;  %v598_v58 = vrot.slane %v583_v50, 7  ;;  %v602_v60 = vrot.slane %v585_v53, 5  ;;  %v472_v12 = vld [vmem:[#allocation2 + $0x1] sm:$0x1] }
  0x50   :  { %v509_v36 = vsel %vm107_vm7, %v508_v32, %v507_v35  ;;  %v604_v61 = vrot.slane %v586_v54, 4  ;;  %v606_v63 = vrot.slane %v587_v55, 3  ;;  %v608_v2 = vrot.slane %v588_v56, 2 }
  0x51   :  { %939 = vmatmul.mubr.msk.f32.vlgmr.msra.gmra.mrb[2].mxu0 %vm109_vm8, %v509_v36  ;;  %v599_v62 = vsel %vm89_vm1, %v598_v58, %v582_v49  ;;  %v610_v4 = vrot.slane %v589_v57, 1  ;;  %v624_v11 = vrot.slane %v473_v9, 7  ;;  %v630_v20 = vrot.slane %v476_v16, 4 }
  0x52   :  { %v632_v24 = vrot.slane %v477_v19, 3  ;;  %v634_v27 = vrot.slane %v478_v23, 2  ;;  %v636_v29 = vrot.slane %v479_v26, 1  ;;  %v1087_v34 = vmov 1966171168  }
  0x53   :  { %v625_v15 = vsel %vm89_vm1, %v624_v11, %v472_v12  ;;  %v408_v35 = vunpack.c.l.s4 %v1087_v34  ;;  %v410_v36 = vlaneseq  ;;  %vm463_vm10 = vcmask 253952  }
  0xdc   :  { %v221_v37 = vpop.xlane.xlu0 %220 }
 0x117   :  { %v178_v13 = vpop.f32.mrb[0].mxu0 }
 0x118   :  { %v919_v14 = vpop.f32.mrb[1].mxu0  ;;  %923 = vmatmul.mubr.msk.f32.vlgmr.msra.gmra.mrb[0].mxu1 %vm109_vm8, %v178_v13  ;;  %v475_v13 = vld [vmem:[#allocation2 + $0x7] sm:$0x1] }
 0x119   :  { %926 = vmatpush3.msra.mxu1 %v243_v51  ;;  %927 = vmatprep.mubr.msk.f32.mxu1 %vm1085_vm0, %v1086_v1  ;;  %v584_v51 = vmul.f32 %v1206_v52, %v482_v17  ;;  %v626_v14 = vrot.slane %v474_v10, 6  ;;  %v628_v17 = vrot.slane %v475_v13, 5 }
 0x11a   :  { %941 = vmatprep.subr.mxu1 %v1086_v1 }
 0x11b   :  { %v600_v59 = vrot.slane %v584_v51, 6  ;;  %v627_v18 = vsel %vm92_vm2, %v626_v14, %v625_v15 }
 0x11c   :  { %v629_v22 = vsel %vm95_vm3, %v628_v17, %v627_v18 }
 0x11d   :  { %v601_v0 = vsel %vm92_vm2, %v600_v59, %v599_v62  ;;  %v631_v25 = vsel %vm98_vm4, %v630_v20, %v629_v22 }
 0x11e   :  { %v603_v3 = vsel %vm95_vm3, %v602_v60, %v601_v0  ;;  %v633_v28 = vsel %vm101_vm5, %v632_v24, %v631_v25 }
 0x11f   :  { %v605_v5 = vsel %vm98_vm4, %v604_v61, %v603_v3  ;;  %v635_v30 = vsel %vm104_vm6, %v634_v27, %v633_v28 }
 0x120   :  { %v607_v6 = vsel %vm101_vm5, %v606_v63, %v605_v5  ;;  %v637_v33 = vsel %vm107_vm7, %v636_v29, %v635_v30 }
 0x121   :  { %v609_v7 = vsel %vm104_vm6, %v608_v2, %v607_v6 }
 0x122   :  { %v611_v52 = vsel %vm107_vm7, %v610_v4, %v609_v7 }
 0x123   :  { %v613_v8 = vsel %vm109_vm8, %v611_v52, 0.0 }
 0x124   :  { %v578_v47 = vpop.f32.mrb[2].mxu0 }
 0x125   :  { %v940_v48 = vpop.f32.mrb[3].mxu0 }
 0x1eb   :  { %v315_v38 = vpop.f32.mrb[0].mxu1 }
 0x1ec   :  { %v316_v39 = vadd.f32 %v315_v38, %v221_v37  ;;  %v924_v40 = vpop.f32.mrb[1].mxu1  ;;  %v409_v37 = vunpack.c.0.s8 %v408_v35  ;;  %v411_v38 = vshrl.u32 %v410_v36, 7 }
 0x1ee   :  { %v320_v41 = vsel %vm319_vm9, %v316_v39, -inf }
 0x1ef   :  { %321 = vmax.xlane.f32.xlu0 %v320_v41 }
 0x27c   :  { %v322_v42 = vpop.xlane.xlu0 %321 }
 0x27d   :  { %v323_v43 = vsub.f32 %v316_v39, %v322_v42  ;;  %v412_v39 = vsub.s32 %v409_v37, %v411_v38 }
 0x27f   :  { %v324_v44 = vmul.f32 1.442695, %v323_v43 }
 0x281   :  { %975 = vpow2.f32 %v324_v44 }
 0x28b   :  { %v976_v45 = vpop.eup %975 }
 0x28c   :  { %v326_v46 = vsel %vm319_vm9, %v976_v45, 0.0 }
 0x28d   :  { %327 = vadd.xlane.f32.xlu1 %v326_v46 }
 0x291   :  { %614 = vadd.xlane.f32.xlu1 %v613_v8 }
 0x31a   :  { %v328_v21 = vpop.xlane.xlu1 %327 }
 0x31b   :  { %977 = vrcp.f32 %v328_v21 }
 0x31e   :  { %v615_v48 = vpop.xlane.xlu1 %614 }
 0x325   :  { %v978_v31 = vpop.eup %977 }
 0x326   :  { %v330_v32 = vmul.f32 %v978_v31, %v976_v45 }
 0x328   :  { %928 = vmatmul.mubr.msk.f32.vlgmr.msra.gmra.mrb[2].mxu1 %vm319_vm9, %v330_v32 }
 0x329   :  { %942 = vmatpush3.xpose.msk.msra.mxu1 %vm109_vm8, %v637_v33  ;;  %943 = vmatprep.mubr.msk.f32.mxu1 %vm1085_vm0, %v1086_v1 }
 0x32a   :  { %946 = vmatprep.subr.mxu1 %v1086_v1 }
 0x32c   :  { %944 = vmatmul.mubr.msk.f32.vlgmr.msra.gmra.mrb[4].mxu1 %vm109_vm8, %v578_v47 }
 0x32d   :  { %947 = vmatpush3.msra.mxu1 %v637_v33  ;;  %948 = vmatprep.mubr.msk.f32.mxu1 %vm1085_vm0, %v1086_v1 }
 0x3fb   :  { %v401_v40 = vpop.f32.mrb[2].mxu1 }
 0x3fc   :  { %v406_v41 = vcombine.high %v401_v40, %v401_v40  ;;  %v413_v42 = vrot.slane %v401_v40, %v412_v39  ;;  %v929_v43 = vpop.f32.mrb[3].mxu1 }
 0x3fe   :  { %v420_v44 = vrot.slane %v406_v41, %v412_v39  ;;  %v421_v45 = vcombine.high %v413_v42, %v413_v42  ;;  %v429_v46 = vrot.slane %v413_v42, %v412_v39 }
 0x3ff   :  { %v709_v47 = vpop.f32.mrb[4].mxu1 }
 0x400   :  { %v422_v49 = vcombine.high %v420_v44, %v420_v44  ;;  %v436_v50 = vrot.slane %v420_v44, %v412_v39  ;;  %v443_v51 = vrot.slane %v421_v45, %v412_v39  ;;  %v451_v1 = vcombine.high %v429_v46, %v429_v46  ;;  %464 = vst.msk [vmem:[#allocation8] sm:$0x1] %vm463_vm10, %v429_v46  ;;  %v945_v53 = vpop.f32.mrb[5].mxu1 }
 0x401   :  { %v710_v54 = vadd.f32 %v709_v47, %v615_v48 }
 0x402   :  { %v450_v55 = vrot.slane %v422_v49, %v412_v39  ;;  %v452_v56 = vcombine.high %v436_v50, %v436_v50  ;;  %v453_v57 = vcombine.high %v443_v51, %v443_v51  ;;  %465 = vst.msk [vmem:[#allocation8 + $0x2] sm:$0x1] %vm463_vm10, %v443_v51  ;;  %466 = vst.msk [vmem:[#allocation8 + $0x4] sm:$0x1] %vm463_vm10, %v451_v1 }
 0x403   :  { %468 = vst.msk [vmem:[#allocation8 + $0x8] sm:$0x1] %vm463_vm10, %v436_v50  ;;  %v713_v58 = vsel %vm319_vm9, %v710_v54, -inf }
 0x404   :  { %v454_v59 = vcombine.high %v450_v55, %v450_v55  ;;  %467 = vst.msk [vmem:[#allocation8 + $0x6] sm:$0x1] %vm463_vm10, %v453_v57  ;;  %469 = vst.msk [vmem:[#allocation8 + $0xa] sm:$0x1] %vm463_vm10, %v450_v55  ;;  %714 = vmax.xlane.f32.xlu0 %v713_v58 }
 0x405   :  { %470 = vst.msk [vmem:[#allocation8 + $0xc] sm:$0x1] %vm463_vm10, %v452_v56 }
 0x406   :  { %471 = vst.msk [vmem:[#allocation8 + $0xe] sm:$0x1] %vm463_vm10, %v454_v59 }
 0x491   :  { %v715_v60 = vpop.xlane.xlu0 %714 }
 0x492   :  { %v716_v61 = vsub.f32 %v710_v54, %v715_v60 }
 0x494   :  { %v717_v62 = vmul.f32 1.442695, %v716_v61 }
 0x496   :  { %979 = vpow2.f32 %v717_v62 }
 0x4a0   :  { %v980_v63 = vpop.eup %979 }
 0x4a1   :  { %v719_v0 = vsel %vm319_vm9, %v980_v63, 0.0 }
 0x4a2   :  { %720 = vadd.xlane.f32.xlu1 %v719_v0 }
 0x52f   :  { %v721_v2 = vpop.xlane.xlu1 %720 }
 0x530   :  { %981 = vrcp.f32 %v721_v2 }
 0x53a   :  { %v982_v3 = vpop.eup %981 }
 0x53b   :  { %v723_v4 = vmul.f32 %v982_v3, %v980_v63 }
 0x53d   :  { %949 = vmatmul.mubr.msk.f32.vlgmr.msra.gmra.mrb[6].mxu1 %vm319_vm9, %v723_v4 }
 0x610   :  { %v794_v5 = vpop.f32.mrb[6].mxu1 }
 0x611   :  { %v799_v6 = vcombine.high %v794_v5, %v794_v5  ;;  %v806_v7 = vrot.slane %v794_v5, %v412_v39  ;;  %v950_v52 = vpop.f32.mrb[7].mxu1 }
 0x613   :  { %v813_v8 = vrot.slane %v799_v6, %v412_v39  ;;  %v814_v9 = vcombine.high %v806_v7, %v806_v7  ;;  %v822_v10 = vrot.slane %v806_v7, %v412_v39 }
 0x615   :  { %v815_v11 = vcombine.high %v813_v8, %v813_v8  ;;  %v829_v12 = vrot.slane %v813_v8, %v412_v39  ;;  %v836_v13 = vrot.slane %v814_v9, %v412_v39  ;;  %v844_v14 = vcombine.high %v822_v10, %v822_v10  ;;  %856 = vst.msk [vmem:[#allocation8 + $0x1] sm:$0x1] %vm463_vm10, %v822_v10 }
 0x617   :  { %v843_v15 = vrot.slane %v815_v11, %v412_v39  ;;  %v845_v16 = vcombine.high %v829_v12, %v829_v12  ;;  %v846_v17 = vcombine.high %v836_v13, %v836_v13  ;;  %857 = vst.msk [vmem:[#allocation8 + $0x3] sm:$0x1] %vm463_vm10, %v836_v13  ;;  %858 = vst.msk [vmem:[#allocation8 + $0x5] sm:$0x1] %vm463_vm10, %v844_v14 }
 0x618   :  { %860 = vst.msk [vmem:[#allocation8 + $0x9] sm:$0x1] %vm463_vm10, %v829_v12 }
 0x619   :  { %v847_v18 = vcombine.high %v843_v15, %v843_v15  ;;  %859 = vst.msk [vmem:[#allocation8 + $0x7] sm:$0x1] %vm463_vm10, %v846_v17  ;;  %861 = vst.msk [vmem:[#allocation8 + $0xb] sm:$0x1] %vm463_vm10, %v843_v15 }
 0x61a   :  { %862 = vst.msk [vmem:[#allocation8 + $0xd] sm:$0x1] %vm463_vm10, %v845_v16 }
 0x61b   :  { %863 = vst.msk [vmem:[#allocation8 + $0xf] sm:$0x1] %vm463_vm10, %v847_v18 }
 0x61c   :  { %1060 = shalt.err (!%p1057_p0)
}
 0x61d   :  { %s1061_s8 = scalar_lea.hbm %s1311_s4, 256 }
 0x61e   :  { %p1062_p1 = scmp.ne.s32.totalorder %s1311_s4, %s1061_s8  ;;  %p1065_p2 = scmp.lt.u32.totalorder %s1061_s8, %s1311_s4 }
 0x620   :  { %p1067_p3 = pnand %p1065_p2, %p1062_p1 }
 0x622   :  { %1070 = shalt.err (!%p1067_p3)
}
 0x623   :  { %875 = dma.vmem_to_hbm [thread:$0]  %s870_s30, 256, %s1311_s4, [#allocation4], %s1079_s27, %s1079_s27, %s1080_s28  }
 0x624   :  { %1075 = dma.done.wait [#allocation4], 256  }
 0x625   :  { %1076 = vsyncadd [#allocation4], 4294967040 }
 0x626   :  { %879 = vsyncpa [#allocation3], 1 }
 0x627   :  { %880 = vsyncpa [#allocation6], 1 }
 0x628   :  { %881 = vsyncpa [#allocation4], 1 }

</bundles_post_ra>
